<compile_context>
chip_gen: v7x
topology: tpu7x:2x2x1
jax: 0.10.0
libtpu: 0.0.40
codegen_flags: <defaults>
</compile_context>

<pallas_src>
import jax
import jax.numpy as jnp
from jax.experimental import pallas as pl
from jax.experimental.pallas import tpu as pltpu

# Encoder dims (synthetic, deterministic).
C, H, W = 4, 16, 16
D_IN = C * H * W           # 1024
HIDDEN = 128
EMBED = 32
OUT_PACK = 128             # lane-dense packed output width (both branches)
EMBED_OFF2 = 64            # lane offset of branch-2 embedding in the packed slab
TM_MAX = 512               # max batch-row tile


def _round_up(n, m):
    return ((n + m - 1) // m) * m


def encoder_kernel(x1_ref, x2_ref, w1_ref, b1_ref, w2a_ref, w2b_ref, b2p_ref,
                   o_ref):
    """Fused shared-weight 2-layer MLP applied to both siamese branches.

    x*_ref : [TM, D_IN]   f32 activation tiles (cast to bf16 in-kernel).
    w1_ref : [D_IN, HIDDEN] bf16 (resident), b1_ref: [1, HIDDEN] f32 (resident).
    w2a_ref/w2b_ref: [HIDDEN, OUT_PACK] bf16 — shared W2 placed at lanes 0:32
                     (branch 1) and 64:96 (branch 2) respectively (resident).
    b2p_ref: [1, OUT_PACK] f32 packed bias (resident).
    o_ref  : [TM, OUT_PACK] bf16 lane-dense packed output tile.
    """
    w1 = w1_ref[...]
    b1 = b1_ref[...]

    def hidden(x_ref):
        # In-kernel f32 -> bf16 cast (VPU, hidden under the activation DMA),
        # MXU matmul with f32 accumulation, bias + ReLU on the f32 path.
        x = x_ref[...].astype(jnp.bfloat16)
        h = jnp.dot(x, w1, preferred_element_type=jnp.float32) + b1
        return jnp.maximum(h, 0.0).astype(jnp.bfloat16)

    h1 = hidden(x1_ref)
    h2 = hidden(x2_ref)

    # Both branches land in disjoint lane ranges of one 128-wide slab:
    # h1 @ W2a writes lanes 0:32, h2 @ W2b writes lanes 64:96 (others exactly 0).
    e = (jnp.dot(h1, w2a_ref[...], preferred_element_type=jnp.float32)
         + jnp.dot(h2, w2b_ref[...], preferred_element_type=jnp.float32)
         + b2p_ref[...])
    o_ref[...] = e.astype(o_ref.dtype)


def init_params():
    """Deterministic f32 parameter init (synthetic — not a checkpoint load)."""
    k = jax.random.PRNGKey(0)
    k1, k2, k3, k4 = jax.random.split(k, 4)
    w1 = jax.random.normal(k1, (D_IN, HIDDEN), jnp.float32) / jnp.sqrt(D_IN)
    b1 = jax.random.normal(k2, (1, HIDDEN), jnp.float32) * 0.01
    w2 = jax.random.normal(k3, (HIDDEN, EMBED), jnp.float32) / jnp.sqrt(HIDDEN)
    b2 = jax.random.normal(k4, (1, EMBED), jnp.float32) * 0.01
    return w1, b1, w2, b2


def prepare_kernel_params(params):
    """Cast weights to bf16 and build the lane-packed W2/b2 copies."""
    w1, b1, w2, b2 = params
    w2a = jnp.zeros((HIDDEN, OUT_PACK), jnp.float32).at[:, :EMBED].set(w2)
    w2b = jnp.zeros((HIDDEN, OUT_PACK), jnp.float32).at[
        :, EMBED_OFF2:EMBED_OFF2 + EMBED].set(w2)
    b2p = jnp.zeros((1, OUT_PACK), jnp.float32).at[:, :EMBED].set(b2)
    b2p = b2p.at[:, EMBED_OFF2:EMBED_OFF2 + EMBED].set(b2)
    return (w1.astype(jnp.bfloat16), b1.astype(jnp.float32),
            w2a.astype(jnp.bfloat16), w2b.astype(jnp.bfloat16),
            b2p.astype(jnp.float32))


def encode_pair(x1f, x2f, kparams):
    """Run the Pallas encoder on two flattened f32 batches [N, D_IN]."""
    w1, b1, w2a, w2b, b2p = kparams
    n = x1f.shape[0]

    # Tile: as large as sensible, but keep >= 2 grid steps when the batch
    # allows it so both v7x TensorCores get work.  Multiple of 16 keeps both
    # f32 input blocks and the bf16 output block sublane-aligned.
    tm = min(TM_MAX, max(16, _round_up(pl.cdiv(n, 2), 16)))
    grid_m = pl.cdiv(n, tm)
    n_pad = grid_m * tm

    if n < tm:
        # Tiny batch: single (partial) block — pad, the copy is negligible.
        pad = ((0, tm - n), (0, 0))
        x1f = jnp.pad(x1f, pad)
        x2f = jnp.pad(x2f, pad)
    # else: no jnp.pad (full-array HBM copy).  The last block may be partial;
    # its unspecified tail rows are independent and sliced off below.

    act_spec = pl.BlockSpec((tm, D_IN), lambda i: (i, 0))
    out_spec = pl.BlockSpec((tm, OUT_PACK), lambda i: (i, 0))

    def resident(shape):
        # Constant block index -> weight/bias block stays resident in VMEM
        # across the whole batch grid (no per-step re-DMA).
        return pl.BlockSpec(shape, lambda i: (0, 0))

    o = pl.pallas_call(
        encoder_kernel,
        out_shape=jax.ShapeDtypeStruct((n_pad, OUT_PACK), jnp.bfloat16),
        grid_spec=pltpu.PrefetchScalarGridSpec(
            num_scalar_prefetch=0,
            grid=(grid_m,),
            in_specs=[act_spec, act_spec,
                      resident((D_IN, HIDDEN)),
                      resident((1, HIDDEN)),
                      resident((HIDDEN, OUT_PACK)),
                      resident((HIDDEN, OUT_PACK)),
                      resident((1, OUT_PACK))],
            out_specs=out_spec,
        ),
        compiler_params=pltpu.CompilerParams(
            dimension_semantics=("parallel",),
            vmem_limit_bytes=32 * 1024 * 1024),
    )(x1f, x2f, w1, b1, w2a, w2b, b2p)

    e1 = o[:n, :EMBED].astype(jnp.float32)
    e2 = o[:n, EMBED_OFF2:EMBED_OFF2 + EMBED].astype(jnp.float32)
    return e1, e2


@jax.jit
def siamese_forward(x1, x2, kparams):
    """SiameseNetwork.forward: shared-weight encoder applied to x1 and x2."""
    # Flatten NCHW -> [B, C*H*W] (row-major over C,H,W, matching torch .view).
    # Stay in f32: the kernel casts to bf16 internally, so the activation DMA
    # is a single f32 read instead of f32-read + bf16-write + bf16-read.
    x1f = x1.reshape(x1.shape[0], -1)
    x2f = x2.reshape(x2.shape[0], -1)
    return encode_pair(x1f, x2f, kparams)


if __name__ == "__main__":
    key = jax.random.PRNGKey(0)
    kx1, kx2 = jax.random.split(key)
    B = 2
    x1 = jax.random.normal(kx1, (B, C, H, W), jnp.float32)
    x2 = jax.random.normal(kx2, (B, C, H, W), jnp.float32)

    params_f32 = init_params()
    kparams = prepare_kernel_params(params_f32)

    emb1, emb2 = siamese_forward(x1, x2, kparams)
    jax.block_until_ready((emb1, emb2))

    assert emb1.shape == (B, EMBED) and emb2.shape == (B, EMBED)

    # Cross-check against a plain-JAX reference that mirrors the bf16 matmul /
    # f32-accumulate recipe used inside the kernel (shared weights per branch).
    w1, b1w, w2, b2w = params_f32

    def ref_enc(x):
        xf = x.reshape(x.shape[0], -1).astype(jnp.bfloat16)
        h = jnp.dot(xf, w1.astype(jnp.bfloat16),
                    preferred_element_type=jnp.float32) + b1w
        h = jnp.maximum(h, 0.0).astype(jnp.bfloat16)
        return jnp.dot(h, w2.astype(jnp.bfloat16),
                       preferred_element_type=jnp.float32) + b2w

    r1, r2 = ref_enc(x1), ref_enc(x2)
    # Kernel output additionally passes through a bf16 store; widen tolerance.
    assert jnp.allclose(emb1, r1, atol=2e-2, rtol=2e-2)
    assert jnp.allclose(emb2, r2, atol=2e-2, rtol=2e-2)

    # TODO(synk): get_loss (pairwise distance + contrastive loss) is not part
    # of forward(); left out of the kernel.
    print("KERNEL_OK")
</pallas_src>

<mosaic_0001>
module attributes {stable_mosaic.version = 11 : i64} {
  func.func @encoder_kernel(%arg0: i32, %arg1: memref<16x1024xf32, #tpu.memory_space<vmem>>, %arg2: memref<16x1024xf32, #tpu.memory_space<vmem>>, %arg3: memref<1024x128xbf16, #tpu.memory_space<vmem>>, %arg4: memref<1x128xf32, #tpu.memory_space<vmem>>, %arg5: memref<128x128xbf16, #tpu.memory_space<vmem>>, %arg6: memref<128x128xbf16, #tpu.memory_space<vmem>>, %arg7: memref<1x128xf32, #tpu.memory_space<vmem>>, %arg8: memref<16x128xbf16, #tpu.memory_space<vmem>>) attributes {dimension_semantics = [#tpu.dimension_semantics<parallel>], iteration_bounds = array<i64: 1>, scalar_prefetch = 0 : i64, scratch_operands = 0 : i64, tpu.core_type = #tpu.core_type<tc>, window_params = [{transform_indices = @transform_0, window_bounds = array<i64: 16, 1024>}, {transform_indices = @transform_1, window_bounds = array<i64: 16, 1024>}, {pipeline_mode = #tpu.pipeline_mode<synchronous>, transform_indices = @transform_2, window_bounds = array<i64: 1024, 128>}, {pipeline_mode = #tpu.pipeline_mode<synchronous>, transform_indices = @transform_3, window_bounds = array<i64: 1, 128>}, {pipeline_mode = #tpu.pipeline_mode<synchronous>, transform_indices = @transform_4, window_bounds = array<i64: 128, 128>}, {pipeline_mode = #tpu.pipeline_mode<synchronous>, transform_indices = @transform_5, window_bounds = array<i64: 128, 128>}, {pipeline_mode = #tpu.pipeline_mode<synchronous>, transform_indices = @transform_6, window_bounds = array<i64: 1, 128>}, {transform_indices = @transform_7, window_bounds = array<i64: 16, 128>}]} {
    %c0 = arith.constant 0 : index
    %c0_0 = arith.constant 0 : index
    %0 = vector.load %arg3[%c0, %c0_0] : memref<1024x128xbf16, #tpu.memory_space<vmem>>, vector<1024x128xbf16>
    %c0_1 = arith.constant 0 : index
    %c0_2 = arith.constant 0 : index
    %1 = vector.load %arg4[%c0_1, %c0_2] : memref<1x128xf32, #tpu.memory_space<vmem>>, vector<1x128xf32>
    %c0_3 = arith.constant 0 : index
    %c0_4 = arith.constant 0 : index
    %2 = vector.load %arg1[%c0_3, %c0_4] : memref<16x1024xf32, #tpu.memory_space<vmem>>, vector<16x1024xf32>
    %3 = arith.truncf %2 : vector<16x1024xf32> to vector<16x1024xbf16>
    %cst = arith.constant dense<0.000000e+00> : vector<16x128xf32>
    %4 = tpu.matmul %3, %0, %cst {dimension_numbers = #tpu.dot_dimension_numbers<[1], [0], [0], [1], [0, 0, 1, 1], [], []>} : vector<16x1024xbf16>, vector<1024x128xbf16>, vector<16x128xf32> -> vector<16x128xf32>
    %5 = vector.broadcast %1 : vector<1x128xf32> to vector<16x128xf32>
    %6 = arith.addf %4, %5 : vector<16x128xf32>
    %cst_5 = arith.constant 0.000000e+00 : f32
    %7 = vector.broadcast %cst_5 : f32 to vector<16x128xf32>
    %8 = arith.maximumf %6, %7 : vector<16x128xf32>
    %9 = arith.truncf %8 : vector<16x128xf32> to vector<16x128xbf16>
    %c0_6 = arith.constant 0 : index
    %c0_7 = arith.constant 0 : index
    %10 = vector.load %arg2[%c0_6, %c0_7] : memref<16x1024xf32, #tpu.memory_space<vmem>>, vector<16x1024xf32>
    %11 = arith.truncf %10 : vector<16x1024xf32> to vector<16x1024xbf16>
    %cst_8 = arith.constant dense<0.000000e+00> : vector<16x128xf32>
    %12 = tpu.matmul %11, %0, %cst_8 {dimension_numbers = #tpu.dot_dimension_numbers<[1], [0], [0], [1], [0, 0, 1, 1], [], []>} : vector<16x1024xbf16>, vector<1024x128xbf16>, vector<16x128xf32> -> vector<16x128xf32>
    %13 = vector.broadcast %1 : vector<1x128xf32> to vector<16x128xf32>
    %14 = arith.addf %12, %13 : vector<16x128xf32>
    %cst_9 = arith.constant 0.000000e+00 : f32
    %15 = vector.broadcast %cst_9 : f32 to vector<16x128xf32>
    %16 = arith.maximumf %14, %15 : vector<16x128xf32>
    %17 = arith.truncf %16 : vector<16x128xf32> to vector<16x128xbf16>
    %c0_10 = arith.constant 0 : index
    %c0_11 = arith.constant 0 : index
    %18 = vector.load %arg5[%c0_10, %c0_11] : memref<128x128xbf16, #tpu.memory_space<vmem>>, vector<128x128xbf16>
    %cst_12 = arith.constant dense<0.000000e+00> : vector<16x128xf32>
    %19 = tpu.matmul %9, %18, %cst_12 {dimension_numbers = #tpu.dot_dimension_numbers<[1], [0], [0], [1], [0, 0, 1, 1], [], []>} : vector<16x128xbf16>, vector<128x128xbf16>, vector<16x128xf32> -> vector<16x128xf32>
    %c0_13 = arith.constant 0 : index
    %c0_14 = arith.constant 0 : index
    %20 = vector.load %arg6[%c0_13, %c0_14] : memref<128x128xbf16, #tpu.memory_space<vmem>>, vector<128x128xbf16>
    %cst_15 = arith.constant dense<0.000000e+00> : vector<16x128xf32>
    %21 = tpu.matmul %17, %20, %cst_15 {dimension_numbers = #tpu.dot_dimension_numbers<[1], [0], [0], [1], [0, 0, 1, 1], [], []>} : vector<16x128xbf16>, vector<128x128xbf16>, vector<16x128xf32> -> vector<16x128xf32>
    %22 = arith.addf %19, %21 : vector<16x128xf32>
    %c0_16 = arith.constant 0 : index
    %c0_17 = arith.constant 0 : index
    %23 = vector.load %arg7[%c0_16, %c0_17] : memref<1x128xf32, #tpu.memory_space<vmem>>, vector<1x128xf32>
    %24 = vector.broadcast %23 : vector<1x128xf32> to vector<16x128xf32>
    %25 = arith.addf %22, %24 : vector<16x128xf32>
    %26 = arith.truncf %25 : vector<16x128xf32> to vector<16x128xbf16>
    %c0_18 = arith.constant 0 : index
    %c0_19 = arith.constant 0 : index
    %27 = vector.load %arg8[%c0_18, %c0_19] : memref<16x128xbf16, #tpu.memory_space<vmem>>, vector<16x128xbf16>
    tpu.vector_store %arg8[%c0_18, %c0_19], %26 {strides = array<i32>} : memref<16x128xbf16, #tpu.memory_space<vmem>>, vector<16x128xbf16>,
    return
  }
  func.func @transform_0(%arg0: i32) -> (i32, i32) {
    %c0_i32 = arith.constant 0 : i32
    %c0_i32_0 = arith.constant 0 : i32
    return %arg0, %c0_i32 : i32, i32
  }
  func.func @transform_1(%arg0: i32) -> (i32, i32) {
    %c0_i32 = arith.constant 0 : i32
    %c0_i32_0 = arith.constant 0 : i32
    return %arg0, %c0_i32 : i32, i32
  }
  func.func @transform_2(%arg0: i32) -> (i32, i32) {
    %c0_i32 = arith.constant 0 : i32
    %c0_i32_0 = arith.constant 0 : i32
    %c0_i32_1 = arith.constant 0 : i32
    return %c0_i32, %c0_i32_0 : i32, i32
  }
  func.func @transform_3(%arg0: i32) -> (i32, i32) {
    %c0_i32 = arith.constant 0 : i32
    %c0_i32_0 = arith.constant 0 : i32
    %c0_i32_1 = arith.constant 0 : i32
    return %c0_i32, %c0_i32_0 : i32, i32
  }
  func.func @transform_4(%arg0: i32) -> (i32, i32) {
    %c0_i32 = arith.constant 0 : i32
    %c0_i32_0 = arith.constant 0 : i32
    %c0_i32_1 = arith.constant 0 : i32
    return %c0_i32, %c0_i32_0 : i32, i32
  }
  func.func @transform_5(%arg0: i32) -> (i32, i32) {
    %c0_i32 = arith.constant 0 : i32
    %c0_i32_0 = arith.constant 0 : i32
    %c0_i32_1 = arith.constant 0 : i32
    return %c0_i32, %c0_i32_0 : i32, i32
  }
  func.func @transform_6(%arg0: i32) -> (i32, i32) {
    %c0_i32 = arith.constant 0 : i32
    %c0_i32_0 = arith.constant 0 : i32
    %c0_i32_1 = arith.constant 0 : i32
    return %c0_i32, %c0_i32_0 : i32, i32
  }
  func.func @transform_7(%arg0: i32) -> (i32, i32) {
    %c0_i32 = arith.constant 0 : i32
    %c0_i32_0 = arith.constant 0 : i32
    return %arg0, %c0_i32 : i32, i32
  }
}

</mosaic_0001>

<bundles_post_ra>
// kernel: siamese_forward.1
= control target key start
LH: loop header
LB: loop body
LE: loop exit
PB: predicated region body
PF: predicated region fallthrough
CT: control target
= control target key end

     0   :  { %12 = vsyncpa [#allocation3], 0  ;;  %s1610_s24 = smov [#allocation2]   ;;  %s2244_s0 = inlined_call_operand.vmem [shape: f32[16,1024], index: 0, kind: input, shape index: {}]   ;;  %s2245_s1 = inlined_call_operand.vmem [shape: f32[16,1024], index: 1, kind: input, shape index: {}]   ;;  %s2246_s2 = inlined_call_operand.vmem [shape: bf16[1024,128], index: 2, kind: input, shape index: {}]   ;;  %s2247_s3 = inlined_call_operand.vmem [shape: f32[1,128], index: 3, kind: input, shape index: {}]   ;;  %s2248_s4 = inlined_call_operand.vmem [shape: bf16[128,128], index: 4, kind: input, shape index: {}]   ;;  %s2249_s5 = inlined_call_operand.hbm [shape: bf16[128,128], index: 5, kind: input, shape index: {}]   ;;  %s2250_s6 = inlined_call_operand.vmem [shape: f32[1,128], index: 6, kind: input, shape index: {}]   ;;  %s2251_s7 = inlined_call_operand.vmem [shape: bf16[16,128], index: 7, kind: output, shape index: {}]  }
   0x1   :  { %s28_s25 = sshll.u32 %s1610_s24, 4  ;;  %s1586_s28 = scalar_lea.hbm %s2249_s5, 1024  ;;  %s29_s25 = int_to_ptr.vmem [resolvable:$true] %s28_s25 }
   0x2   :  { %p1587_p0 = scmp.ne.s32.totalorder %s2249_s5, %s1586_s28  ;;  %p1590_p1 = scmp.lt.u32.totalorder %s1586_s28, %s2249_s5 }
   0x4   :  { %p1592_p2 = pnand %p1590_p1, %p1587_p0 }
   0x6   :  { %1595 = shalt.err (!%p1592_p2)
}
   0x7   :  { %s1596_s10 = scalar_lea.vmem %s29_s25, 1024  ;;  %p1601_p4 = scmp.lt.s32.totalorder %s29_s25, %s29_s25 }
   0x8   :  { %p1597_p3 = scmp.ne.s32.totalorder %s29_s25, %s1596_s10  ;;  %p1602_p5 = scmp.lt.s32.totalorder %s1596_s10, %s1596_s10 }
   0xa   :  { %p1603_p6 = por %p1602_p5, %p1601_p4 }
   0xc   :  { %p1604_p7 = pnand %p1603_p6, %p1597_p3 }
   0xe   :  { %1607 = shalt.err (!%p1604_p7)
}
   0xf   :  { %s1611_s11 = smov 64   ;;  %s1612_s12 = smov 4  }
  0x10   :  { %34 = dma.hbm_to_vmem [thread:$0]  %s2249_s5, 1024, %s29_s25, [#allocation3], %s1611_s11, %s1611_s11, %s1612_s12  }
  0x11   :  { %1608 = dma.done.wait [#allocation3], 1024  }
  0x12   :  { %1609 = vsyncadd [#allocation3], 4294966272  ;;  %v1670_v0 = vld [vmem:[%s2246_s2 + $0x40] sm:$0xff]   ;;  %v1693_v4 = vld [vmem:[%s2246_s2 + $0x48] sm:$0xff]   ;;  %vm1614_vm0 = vmmov 0  }
  0x13   :  { %v1675_v1 = vld [vmem:[%s2246_s2 + $0xc0] sm:$0xff]   ;;  %1267 = vmatprep.subr.bf16.mxu0 %v1670_v0  ;;  %v1699_v5 = vld [vmem:[%s2246_s2 + $0xc8] sm:$0xff]   ;;  %v1717_v8 = vld [vmem:[%s2246_s2 + $0x50] sm:$0xff]  }
  0x14   :  { %v1681_v2 = vld [vmem:[%s2246_s2] sm:$0xff]   ;;  %1289 = vmatprep.subr.bf16.mxu1 %v1675_v1  ;;  %v1705_v6 = vld [vmem:[%s2246_s2 + $0x8] sm:$0xff]   ;;  %v1723_v9 = vld [vmem:[%s2246_s2 + $0xd0] sm:$0xff]  }
  0x15   :  { %v1687_v3 = vld [vmem:[%s2246_s2 + $0x80] sm:$0xff]   ;;  %1268 = vmatpush3.bf16.msra.mxu0 %v1681_v2  ;;  %v1711_v7 = vld [vmem:[%s2246_s2 + $0x88] sm:$0xff]   ;;  %v1729_v10 = vld [vmem:[%s2246_s2 + $0x10] sm:$0xff]  }
  0x16   :  { %1290 = vmatpush3.bf16.msra.mxu1 %v1687_v3  ;;  %1269 = vmatprep.subr.bf16.mxu0 %v1693_v4  ;;  %v1735_v11 = vld [vmem:[%s2246_s2 + $0x90] sm:$0xff]   ;;  %v1741_v12 = vld [vmem:[%s2246_s2 + $0x58] sm:$0xff]   ;;  %v1765_v16 = vld [vmem:[%s2246_s2 + $0x60] sm:$0xff]  }
  0x17   :  { %1291 = vmatprep.subr.bf16.mxu1 %v1699_v5  ;;  %v1747_v13 = vld [vmem:[%s2246_s2 + $0xd8] sm:$0xff]   ;;  %v1771_v17 = vld [vmem:[%s2246_s2 + $0xe0] sm:$0xff]   ;;  %v1789_v20 = vld [vmem:[%s2246_s2 + $0x68] sm:$0xff]  }
  0x18   :  { %v1753_v14 = vld [vmem:[%s2246_s2 + $0x18] sm:$0xff]   ;;  %v1777_v18 = vld [vmem:[%s2246_s2 + $0x20] sm:$0xff]   ;;  %v1795_v21 = vld [vmem:[%s2246_s2 + $0xe8] sm:$0xff]  }
  0x19   :  { %1270 = vmatpush3.bf16.msra.mxu0 %v1705_v6  ;;  %v1759_v15 = vld [vmem:[%s2246_s2 + $0x98] sm:$0xff]   ;;  %v1783_v19 = vld [vmem:[%s2246_s2 + $0xa0] sm:$0xff]   ;;  %v1801_v22 = vld [vmem:[%s2246_s2 + $0x28] sm:$0xff]  }
  0x1a   :  { %1292 = vmatpush3.bf16.msra.mxu1 %v1711_v7  ;;  %1271 = vmatprep.subr.bf16.mxu0 %v1717_v8  ;;  %v1807_v23 = vld [vmem:[%s2246_s2 + $0xa8] sm:$0xff]   ;;  %v1813_v24 = vld [vmem:[%s2246_s2 + $0x70] sm:$0xff]   ;;  %v1837_v28 = vld [vmem:[%s2246_s2 + $0x78] sm:$0xff]  }
  0x1b   :  { %1293 = vmatprep.subr.bf16.mxu1 %v1723_v9  ;;  %v1819_v25 = vld [vmem:[%s2246_s2 + $0xf0] sm:$0xff]   ;;  %v1843_v29 = vld [vmem:[%s2246_s2 + $0xf8] sm:$0xff]   ;;  %v171_v32 = vld [vmem:[%s2244_s0 + $0x8] sm:$0xff] }
  0x1c   :  { %v1825_v26 = vld [vmem:[%s2246_s2 + $0x30] sm:$0xff]   ;;  %v1849_v30 = vld [vmem:[%s2246_s2 + $0x38] sm:$0xff]   ;;  %v179_v33 = vld [vmem:[%s2244_s0 + $0x48] sm:$0xff] }
  0x1d   :  { %1272 = vmatpush3.bf16.msra.mxu0 %v1729_v10  ;;  %v1831_v27 = vld [vmem:[%s2246_s2 + $0xb0] sm:$0xff]   ;;  %v1855_v31 = vld [vmem:[%s2246_s2 + $0xb8] sm:$0xff]   ;;  %v187_v35 = vpack.c.bf16 %v179_v33, %v171_v32  ;;  %v170_v37 = vld [vmem:[%s2244_s0] sm:$0xff] }
  0x1e   :  { %1294 = vmatpush3.bf16.msra.mxu1 %v1735_v11  ;;  %1273 = vmatprep.subr.bf16.mxu0 %v1741_v12  ;;  %v173_v34 = vld [vmem:[%s2244_s0 + $0x18] sm:$0xff]  ;;  %v178_v38 = vld [vmem:[%s2244_s0 + $0x40] sm:$0xff]  ;;  %v172_v41 = vld [vmem:[%s2244_s0 + $0x10] sm:$0xff] }
  0x1f   :  { %1295 = vmatprep.subr.bf16.mxu1 %v1747_v13  ;;  %v181_v36 = vld [vmem:[%s2244_s0 + $0x58] sm:$0xff]  ;;  %v186_v40 = vpack.c.bf16 %v178_v38, %v170_v37  ;;  %v180_v42 = vld [vmem:[%s2244_s0 + $0x50] sm:$0xff]  ;;  %616 = vmatprep.mubr.bf16.mxu0 %v187_v35  ;;  %v1886_v44 = vld [vmem:[%s2246_s2 + $0x140] sm:$0xff]  }
  0x20   :  { %v189_v39 = vpack.c.bf16 %v181_v36, %v173_v34  ;;  %v188_v43 = vpack.c.bf16 %v180_v42, %v172_v41  ;;  %v1891_v45 = vld [vmem:[%s2246_s2 + $0x1c0] sm:$0xff]   ;;  %v1909_v48 = vld [vmem:[%s2246_s2 + $0x148] sm:$0xff]   ;;  %v1933_v52 = vld [vmem:[%s2246_s2 + $0x150] sm:$0xff]  }
  0x21   :  { %1274 = vmatpush3.bf16.msra.mxu0 %v1753_v14  ;;  %v1897_v46 = vld [vmem:[%s2246_s2 + $0x100] sm:$0xff]   ;;  %v1915_v49 = vld [vmem:[%s2246_s2 + $0x1c8] sm:$0xff]   ;;  %v1939_v53 = vld [vmem:[%s2246_s2 + $0x1d0] sm:$0xff]  }
  0x22   :  { %1296 = vmatpush3.bf16.msra.mxu1 %v1759_v15  ;;  %1275 = vmatprep.subr.bf16.mxu0 %v1765_v16  ;;  %v1903_v47 = vld [vmem:[%s2246_s2 + $0x180] sm:$0xff]   ;;  %v1921_v50 = vld [vmem:[%s2246_s2 + $0x108] sm:$0xff]   ;;  %v1945_v54 = vld [vmem:[%s2246_s2 + $0x110] sm:$0xff]  }
  0x23   :  { %1297 = vmatprep.subr.bf16.mxu1 %v1771_v17  ;;  %657 = vmatprep.mubr.bf16.mxu1 %v189_v39  ;;  %v1927_v51 = vld [vmem:[%s2246_s2 + $0x188] sm:$0xff]   ;;  %v1951_v55 = vld [vmem:[%s2246_s2 + $0x190] sm:$0xff]   ;;  %v1957_v56 = vld [vmem:[%s2246_s2 + $0x158] sm:$0xff]  }
  0x24   :  { %v1963_v57 = vld [vmem:[%s2246_s2 + $0x1d8] sm:$0xff]   ;;  %v1981_v60 = vld [vmem:[%s2246_s2 + $0x160] sm:$0xff]   ;;  %v2005_v32 = vld [vmem:[%s2246_s2 + $0x168] sm:$0xff]  }
  0x25   :  { %1276 = vmatpush3.bf16.msra.mxu0 %v1777_v18  ;;  %v1969_v58 = vld [vmem:[%s2246_s2 + $0x118] sm:$0xff]   ;;  %v1987_v61 = vld [vmem:[%s2246_s2 + $0x1e0] sm:$0xff]   ;;  %v2011_v33 = vld [vmem:[%s2246_s2 + $0x1e8] sm:$0xff]  }
  0x26   :  { %1298 = vmatpush3.bf16.msra.mxu1 %v1783_v19  ;;  %1277 = vmatprep.subr.bf16.mxu0 %v1789_v20  ;;  %v1975_v59 = vld [vmem:[%s2246_s2 + $0x198] sm:$0xff]   ;;  %v1993_v62 = vld [vmem:[%s2246_s2 + $0x120] sm:$0xff]   ;;  %2263 = vst [vmem:[#allocation5_spill] sm:$0xff] %v2011_v33  ;;  %v2017_v34 = vld [vmem:[%s2246_s2 + $0x128] sm:$0xff]  }
  0x27   :  { %1299 = vmatprep.subr.bf16.mxu1 %v1795_v21  ;;  %v1999_v63 = vld [vmem:[%s2246_s2 + $0x1a0] sm:$0xff]   ;;  %2264 = vst [vmem:[#allocation6_spill] sm:$0xff] %v2017_v34  ;;  %v2023_v35 = vld [vmem:[%s2246_s2 + $0x1a8] sm:$0xff]   ;;  %v2029_v36 = vld [vmem:[%s2246_s2 + $0x170] sm:$0xff]  }
  0x28   :  { %2265 = vst [vmem:[#allocation7_spill] sm:$0xff] %v2023_v35  ;;  %2266 = vst [vmem:[#allocation8_spill] sm:$0xff] %v2029_v36  ;;  %v2035_v37 = vld [vmem:[%s2246_s2 + $0x1f0] sm:$0xff]   ;;  %v2059_v41 = vld [vmem:[%s2246_s2 + $0x1f8] sm:$0xff]  }
  0x29   :  { %1278 = vmatpush3.bf16.msra.mxu0 %v1801_v22  ;;  %2267 = vst [vmem:[#allocation9_spill] sm:$0xff] %v2035_v37  ;;  %v2041_v38 = vld [vmem:[%s2246_s2 + $0x130] sm:$0xff]   ;;  %2271 = vst [vmem:[#allocation13_spill] sm:$0xff] %v2059_v41  ;;  %v2065_v42 = vld [vmem:[%s2246_s2 + $0x138] sm:$0xff]  }
  0x2a   :  { %1300 = vmatpush3.bf16.msra.mxu1 %v1807_v23  ;;  %1279 = vmatprep.subr.bf16.mxu0 %v1813_v24  ;;  %2268 = vst [vmem:[#allocation10_spill] sm:$0xff] %v2041_v38  ;;  %v2047_v39 = vld [vmem:[%s2246_s2 + $0x1b0] sm:$0xff]   ;;  %2272 = vst [vmem:[#allocation14_spill] sm:$0xff] %v2065_v42 }
  0x2b   :  { %1301 = vmatprep.subr.bf16.mxu1 %v1819_v25  ;;  %2269 = vst [vmem:[#allocation11_spill] sm:$0xff] %v2047_v39 }
  0x2d   :  { %1280 = vmatpush3.bf16.msra.mxu0 %v1825_v26 }
  0x2e   :  { %1302 = vmatpush3.bf16.msra.mxu1 %v1831_v27  ;;  %1281 = vmatprep.subr.bf16.mxu0 %v1837_v28 }
  0x2f   :  { %1303 = vmatprep.subr.bf16.mxu1 %v1843_v29 }
  0x31   :  { %1282 = vmatpush3.bf16.msra.mxu0 %v1849_v30 }
  0x32   :  { %1304 = vmatpush3.bf16.msra.mxu1 %v1855_v31  ;;  %1311 = vmatprep.subr.bf16.mxu0 %v1886_v44 }
  0x33   :  { %1333 = vmatprep.subr.bf16.mxu1 %v1891_v45 }
  0x34   :  { %617 = vmatmul.mubr.bf16.vlgmr.msra.gmra.mrb[0].mxu0 %v186_v40  ;;  %v2053_v40 = vld [vmem:[%s2246_s2 + $0x178] sm:$0xff]  }
  0x35   :  { %658 = vmatmul.mubr.bf16.vlgmr.msra.gmra.mrb[0].mxu1 %v188_v43  ;;  %1312 = vmatpush3.bf16.msra.mxu0 %v1897_v46  ;;  %2270 = vst [vmem:[#allocation12_spill] sm:$0xff] %v2053_v40  ;;  %v2071_v43 = vld [vmem:[%s2246_s2 + $0x1b8] sm:$0xff]  }
  0x36   :  { %1334 = vmatpush3.bf16.msra.mxu1 %v1903_v47  ;;  %1313 = vmatprep.subr.bf16.mxu0 %v1909_v48  ;;  %2273 = vst [vmem:[#allocation15_spill] sm:$0xff] %v2071_v43 }
  0x37   :  { %1335 = vmatprep.subr.bf16.mxu1 %v1915_v49 }
  0x39   :  { %1314 = vmatpush3.bf16.msra.mxu0 %v1921_v50 }
  0x3a   :  { %1336 = vmatpush3.bf16.msra.mxu1 %v1927_v51  ;;  %1315 = vmatprep.subr.bf16.mxu0 %v1933_v52 }
  0x3b   :  { %1337 = vmatprep.subr.bf16.mxu1 %v1939_v53 }
  0x3d   :  { %1316 = vmatpush3.bf16.msra.mxu0 %v1945_v54 }
  0x3e   :  { %1338 = vmatpush3.bf16.msra.mxu1 %v1951_v55  ;;  %1317 = vmatprep.subr.bf16.mxu0 %v1957_v56 }
  0x3f   :  { %1339 = vmatprep.subr.bf16.mxu1 %v1963_v57 }
  0x41   :  { %1318 = vmatpush3.bf16.msra.mxu0 %v1969_v58 }
  0x42   :  { %1340 = vmatpush3.bf16.msra.mxu1 %v1975_v59  ;;  %1319 = vmatprep.subr.bf16.mxu0 %v1981_v60 }
  0x43   :  { %1341 = vmatprep.subr.bf16.mxu1 %v1987_v61 }
  0x45   :  { %1320 = vmatpush3.bf16.msra.mxu0 %v1993_v62 }
  0x46   :  { %1342 = vmatpush3.bf16.msra.mxu1 %v1999_v63  ;;  %1321 = vmatprep.subr.bf16.mxu0 %v2005_v32 }
  0x47   :  { %1343 = vmatprep.subr.bf16.mxu1 %v2011_v33 }
  0x49   :  { %1322 = vmatpush3.bf16.msra.mxu0 %v2017_v34  ;;  %v176_v34 = vld [vmem:[%s2244_s0 + $0x30] sm:$0xff] }
  0x4a   :  { %1344 = vmatpush3.bf16.msra.mxu1 %v2023_v35  ;;  %1323 = vmatprep.subr.bf16.mxu0 %v2029_v36  ;;  %v182_v35 = vld [vmem:[%s2244_s0 + $0x60] sm:$0xff] }
  0x4b   :  { %1345 = vmatprep.subr.bf16.mxu1 %v2035_v37 }
  0x4d   :  { %1324 = vmatpush3.bf16.msra.mxu0 %v2041_v38  ;;  %v177_v38 = vld [vmem:[%s2244_s0 + $0x38] sm:$0xff] }
  0x4e   :  { %1346 = vmatpush3.bf16.msra.mxu1 %v2047_v39  ;;  %1325 = vmatprep.subr.bf16.mxu0 %v2053_v40  ;;  %v175_v39 = vld [vmem:[%s2244_s0 + $0x28] sm:$0xff] }
  0x4f   :  { %1347 = vmatprep.subr.bf16.mxu1 %v2059_v41  ;;  %v183_v40 = vld [vmem:[%s2244_s0 + $0x68] sm:$0xff]  ;;  %v185_v41 = vld [vmem:[%s2244_s0 + $0x78] sm:$0xff] }
  0x50   :  { %v191_v37 = vpack.c.bf16 %v183_v40, %v175_v39  ;;  %v193_v36 = vpack.c.bf16 %v185_v41, %v177_v38  ;;  %v184_v39 = vld [vmem:[%s2244_s0 + $0x70] sm:$0xff]  ;;  %v752_v38 = vld [vmem:[%s2245_s1 + $0x8] sm:$0xff] }
  0x51   :  { %1326 = vmatpush3.bf16.msra.mxu0 %v2065_v42  ;;  %v174_v42 = vld [vmem:[%s2244_s0 + $0x20] sm:$0xff]  ;;  %v760_v40 = vld [vmem:[%s2245_s1 + $0x48] sm:$0xff]  ;;  %v192_v41 = vpack.c.bf16 %v184_v39, %v176_v34 }
  0x52   :  { %1348 = vmatpush3.bf16.msra.mxu1 %v2071_v43  ;;  %1355 = vmatprep.subr.bf16.mxu0 %v1670_v0  ;;  %v190_v33 = vpack.c.bf16 %v182_v35, %v174_v42  ;;  %v768_v43 = vpack.c.bf16 %v760_v40, %v752_v38  ;;  %v754_v0 = vld [vmem:[%s2245_s1 + $0x18] sm:$0xff] }
  0x53   :  { %1377 = vmatprep.subr.bf16.mxu1 %v1675_v1  ;;  %698 = vmatprep.mubr.bf16.mxu0 %v191_v37  ;;  %v762_v1 = vld [vmem:[%s2245_s1 + $0x58] sm:$0xff] }
  0x54   :  { %739 = vmatprep.mubr.bf16.mxu1 %v193_v36  ;;  %699 = vmatmul.mubr.bf16.vlgmr.msra.gmra.mrb[4].mxu0 %v190_v33  ;;  %v770_v35 = vpack.c.bf16 %v762_v1, %v754_v0 }
  0x55   :  { %740 = vmatmul.mubr.bf16.vlgmr.msra.gmra.mrb[4].mxu1 %v192_v41  ;;  %1356 = vmatpush3.bf16.msra.mxu0 %v1681_v2  ;;  %v751_v2 = vld [vmem:[%s2245_s1] sm:$0xff] }
  0x56   :  { %1378 = vmatpush3.bf16.msra.mxu1 %v1687_v3  ;;  %1357 = vmatprep.subr.bf16.mxu0 %v1693_v4  ;;  %v759_v3 = vld [vmem:[%s2245_s1 + $0x40] sm:$0xff]  ;;  %v753_v4 = vld [vmem:[%s2245_s1 + $0x10] sm:$0xff] }
  0x57   :  { %1379 = vmatprep.subr.bf16.mxu1 %v1699_v5  ;;  %807 = vmatprep.mubr.bf16.mxu0 %v768_v43  ;;  %v761_v5 = vld [vmem:[%s2245_s1 + $0x50] sm:$0xff] }
  0x58   :  { %848 = vmatprep.mubr.bf16.mxu1 %v770_v35 }
  0x59   :  { %1358 = vmatpush3.bf16.msra.mxu0 %v1705_v6  ;;  %v767_v6 = vpack.c.bf16 %v759_v3, %v751_v2 }
  0x5a   :  { %1380 = vmatpush3.bf16.msra.mxu1 %v1711_v7  ;;  %1359 = vmatprep.subr.bf16.mxu0 %v1717_v8  ;;  %v756_v7 = vld [vmem:[%s2245_s1 + $0x28] sm:$0xff] }
  0x5b   :  { %1381 = vmatprep.subr.bf16.mxu1 %v1723_v9  ;;  %v764_v8 = vld [vmem:[%s2245_s1 + $0x68] sm:$0xff]  ;;  %v769_v9 = vpack.c.bf16 %v761_v5, %v753_v4 }
  0x5d   :  { %1360 = vmatpush3.bf16.msra.mxu0 %v1729_v10  ;;  %v758_v10 = vld [vmem:[%s2245_s1 + $0x38] sm:$0xff] }
  0x5e   :  { %1382 = vmatpush3.bf16.msra.mxu1 %v1735_v11  ;;  %1361 = vmatprep.subr.bf16.mxu0 %v1741_v12  ;;  %v766_v11 = vld [vmem:[%s2245_s1 + $0x78] sm:$0xff]  ;;  %v772_v12 = vpack.c.bf16 %v764_v8, %v756_v7 }
  0x5f   :  { %1383 = vmatprep.subr.bf16.mxu1 %v1747_v13  ;;  %v774_v13 = vpack.c.bf16 %v766_v11, %v758_v10 }
  0x61   :  { %1362 = vmatpush3.bf16.msra.mxu0 %v1753_v14  ;;  %v2274_v14 = vld [vmem:[#allocation5_spill] sm:$0xff] }
  0x62   :  { %1384 = vmatpush3.bf16.msra.mxu1 %v1759_v15  ;;  %1363 = vmatprep.subr.bf16.mxu0 %v1765_v16  ;;  %v2275_v15 = vld [vmem:[#allocation6_spill] sm:$0xff]  ;;  %v2276_v16 = vld [vmem:[#allocation7_spill] sm:$0xff] }
  0x63   :  { %1385 = vmatprep.subr.bf16.mxu1 %v1771_v17  ;;  %v2277_v17 = vld [vmem:[#allocation8_spill] sm:$0xff] }
  0x65   :  { %1364 = vmatpush3.bf16.msra.mxu0 %v1777_v18  ;;  %v2278_v18 = vld [vmem:[#allocation9_spill] sm:$0xff] }
  0x66   :  { %1386 = vmatpush3.bf16.msra.mxu1 %v1783_v19  ;;  %1365 = vmatprep.subr.bf16.mxu0 %v1789_v20  ;;  %v2279_v19 = vld [vmem:[#allocation10_spill] sm:$0xff]  ;;  %v755_v20 = vld [vmem:[%s2245_s1 + $0x20] sm:$0xff] }
  0x67   :  { %1387 = vmatprep.subr.bf16.mxu1 %v1795_v21  ;;  %v763_v21 = vld [vmem:[%s2245_s1 + $0x60] sm:$0xff] }
  0x69   :  { %1366 = vmatpush3.bf16.msra.mxu0 %v1801_v22  ;;  %v2280_v22 = vld [vmem:[#allocation11_spill] sm:$0xff] }
  0x6a   :  { %1388 = vmatpush3.bf16.msra.mxu1 %v1807_v23  ;;  %1367 = vmatprep.subr.bf16.mxu0 %v1813_v24  ;;  %v2281_v23 = vld [vmem:[#allocation12_spill] sm:$0xff]  ;;  %v757_v24 = vld [vmem:[%s2245_s1 + $0x30] sm:$0xff] }
  0x6b   :  { %1389 = vmatprep.subr.bf16.mxu1 %v1819_v25  ;;  %v765_v25 = vld [vmem:[%s2245_s1 + $0x70] sm:$0xff] }
  0x6d   :  { %1368 = vmatpush3.bf16.msra.mxu0 %v1825_v26  ;;  %v2282_v26 = vld [vmem:[#allocation13_spill] sm:$0xff] }
  0x6e   :  { %1390 = vmatpush3.bf16.msra.mxu1 %v1831_v27  ;;  %1369 = vmatprep.subr.bf16.mxu0 %v1837_v28  ;;  %v771_v27 = vpack.c.bf16 %v763_v21, %v755_v20  ;;  %v2283_v28 = vld [vmem:[#allocation14_spill] sm:$0xff] }
  0x6f   :  { %1391 = vmatprep.subr.bf16.mxu1 %v1843_v29  ;;  %v773_v29 = vpack.c.bf16 %v765_v25, %v757_v24 }
  0x71   :  { %1370 = vmatpush3.bf16.msra.mxu0 %v1849_v30  ;;  %v2284_v30 = vld [vmem:[#allocation15_spill] sm:$0xff] }
  0x72   :  { %1392 = vmatpush3.bf16.msra.mxu1 %v1855_v31  ;;  %1399 = vmatprep.subr.bf16.mxu0 %v1886_v44  ;;  %v1570_v31 = vld [vmem:[%s2248_s4] sm:$0xff]   ;;  %v1613_v44 = vmov 0.0  }
  0x73   :  { %1421 = vmatprep.subr.bf16.mxu1 %v1891_v45  ;;  %v1571_v45 = vld [vmem:[%s2248_s4 + $0x8] sm:$0xff]  }
  0x74   :  { %808 = vmatmul.mubr.bf16.vlgmr.msra.gmra.mrb[8].mxu0 %v767_v6 }
  0x75   :  { %849 = vmatmul.mubr.bf16.vlgmr.msra.gmra.mrb[8].mxu1 %v769_v9  ;;  %1400 = vmatpush3.bf16.msra.mxu0 %v1897_v46  ;;  %v1572_v46 = vld [vmem:[%s2248_s4 + $0x10] sm:$0xff]  }
  0x76   :  { %1422 = vmatpush3.bf16.msra.mxu1 %v1903_v47  ;;  %1401 = vmatprep.subr.bf16.mxu0 %v1909_v48  ;;  %v1573_v47 = vld [vmem:[%s2248_s4 + $0x18] sm:$0xff]   ;;  %v1574_v48 = vld [vmem:[%s2248_s4 + $0x20] sm:$0xff]  }
  0x77   :  { %1423 = vmatprep.subr.bf16.mxu1 %v1915_v49  ;;  %889 = vmatprep.mubr.bf16.mxu0 %v772_v12  ;;  %v1575_v49 = vld [vmem:[%s2248_s4 + $0x28] sm:$0xff]  }
  0x78   :  { %930 = vmatprep.mubr.bf16.mxu1 %v774_v13 }
  0x79   :  { %1402 = vmatpush3.bf16.msra.mxu0 %v1921_v50  ;;  %v1576_v50 = vld [vmem:[%s2248_s4 + $0x30] sm:$0xff]  }
  0x7a   :  { %1424 = vmatpush3.bf16.msra.mxu1 %v1927_v51  ;;  %1403 = vmatprep.subr.bf16.mxu0 %v1933_v52  ;;  %v1577_v51 = vld [vmem:[%s2248_s4 + $0x38] sm:$0xff]   ;;  %v1578_v52 = vld [vmem:[#allocation2] sm:$0xff]  }
  0x7b   :  { %1425 = vmatprep.subr.bf16.mxu1 %v1939_v53  ;;  %v1579_v53 = vld [vmem:[#allocation2 + $0x8] sm:$0xff]  }
  0x7d   :  { %1404 = vmatpush3.bf16.msra.mxu0 %v1945_v54  ;;  %v1580_v54 = vld [vmem:[#allocation2 + $0x10] sm:$0xff]  }
  0x7e   :  { %1426 = vmatpush3.bf16.msra.mxu1 %v1951_v55  ;;  %1405 = vmatprep.subr.bf16.mxu0 %v1957_v56  ;;  %v1581_v55 = vld [vmem:[#allocation2 + $0x18] sm:$0xff]   ;;  %v1582_v56 = vld [vmem:[#allocation2 + $0x20] sm:$0xff]  }
  0x7f   :  { %1427 = vmatprep.subr.bf16.mxu1 %v1963_v57  ;;  %v1583_v57 = vld [vmem:[#allocation2 + $0x28] sm:$0xff]  }
  0x81   :  { %1406 = vmatpush3.bf16.msra.mxu0 %v1969_v58  ;;  %v1584_v58 = vld [vmem:[#allocation2 + $0x30] sm:$0xff]  }
  0x82   :  { %1428 = vmatpush3.bf16.msra.mxu1 %v1975_v59  ;;  %1407 = vmatprep.subr.bf16.mxu0 %v1981_v60  ;;  %v1585_v59 = vld [vmem:[#allocation2 + $0x38] sm:$0xff]  }
  0x83   :  { %1429 = vmatprep.subr.bf16.mxu1 %v1987_v61 }
  0x85   :  { %1408 = vmatpush3.bf16.msra.mxu0 %v1993_v62  ;;  %v1176_v62 = vld [vmem:[%s2247_s3] ss:$0 sm:$0xff] }
  0x86   :  { %1430 = vmatpush3.bf16.msra.mxu1 %v1999_v63  ;;  %1409 = vmatprep.subr.bf16.mxu0 %v2005_v32 }
  0x87   :  { %1431 = vmatprep.subr.bf16.mxu1 %v2274_v14 }
  0x89   :  { %1410 = vmatpush3.bf16.msra.mxu0 %v2275_v15 }
  0x8a   :  { %1432 = vmatpush3.bf16.msra.mxu1 %v2276_v16  ;;  %1411 = vmatprep.subr.bf16.mxu0 %v2277_v17 }
  0x8b   :  { %1433 = vmatprep.subr.bf16.mxu1 %v2278_v18 }
  0x8d   :  { %1412 = vmatpush3.bf16.msra.mxu0 %v2279_v19 }
  0x8e   :  { %1434 = vmatpush3.bf16.msra.mxu1 %v2280_v22  ;;  %1413 = vmatprep.subr.bf16.mxu0 %v2281_v23 }
  0x8f   :  { %1435 = vmatprep.subr.bf16.mxu1 %v2282_v26 }
  0x91   :  { %1414 = vmatpush3.bf16.msra.mxu0 %v2283_v28 }
  0x92   :  { %1436 = vmatpush3.bf16.msra.mxu1 %v2284_v30  ;;  %1461 = vmatprep.subr.bf16.mxu0 %v1613_v44 }
  0x93   :  { %1481 = vmatprep.subr.bf16.mxu1 %v1613_v44 }
  0x94   :  { %890 = vmatmul.mubr.bf16.vlgmr.msra.gmra.mrb[12].mxu0 %v771_v27 }
  0x95   :  { %931 = vmatmul.mubr.bf16.vlgmr.msra.gmra.mrb[12].mxu1 %v773_v29  ;;  %1477 = vmatprep.mubr.msk.bf16.mxu0 %vm1614_vm0, %v1613_v44 }
  0x96   :  { %1482 = vmatpush3.bf16.msra.mxu1 %v1570_v31  ;;  %1497 = vmatprep.mubr.msk.bf16.mxu1 %vm1614_vm0, %v1613_v44 }
  0x97   :  { %1483 = vmatprep.subr.bf16.mxu1 %v1613_v44  ;;  %1462 = vmatpush3.bf16.msra.mxu0 %v1578_v52 }
  0x98   :  { %1463 = vmatprep.subr.bf16.mxu0 %v1613_v44 }
  0x9a   :  { %1484 = vmatpush3.bf16.msra.mxu1 %v1571_v45 }
  0x9b   :  { %1485 = vmatprep.subr.bf16.mxu1 %v1613_v44  ;;  %1464 = vmatpush3.bf16.msra.mxu0 %v1579_v53 }
  0x9c   :  { %1465 = vmatprep.subr.bf16.mxu0 %v1613_v44 }
  0x9e   :  { %1486 = vmatpush3.bf16.msra.mxu1 %v1572_v46 }
  0x9f   :  { %1487 = vmatprep.subr.bf16.mxu1 %v1613_v44  ;;  %1466 = vmatpush3.bf16.msra.mxu0 %v1580_v54 }
  0xa0   :  { %1467 = vmatprep.subr.bf16.mxu0 %v1613_v44 }
  0xa2   :  { %1488 = vmatpush3.bf16.msra.mxu1 %v1573_v47 }
  0xa3   :  { %1489 = vmatprep.subr.bf16.mxu1 %v1613_v44  ;;  %1468 = vmatpush3.bf16.msra.mxu0 %v1581_v55 }
  0xa4   :  { %1469 = vmatprep.subr.bf16.mxu0 %v1613_v44 }
  0xa6   :  { %1490 = vmatpush3.bf16.msra.mxu1 %v1574_v48 }
  0xa7   :  { %1491 = vmatprep.subr.bf16.mxu1 %v1613_v44  ;;  %1470 = vmatpush3.bf16.msra.mxu0 %v1582_v56 }
  0xa8   :  { %1471 = vmatprep.subr.bf16.mxu0 %v1613_v44 }
  0xaa   :  { %1492 = vmatpush3.bf16.msra.mxu1 %v1575_v49 }
  0xab   :  { %1493 = vmatprep.subr.bf16.mxu1 %v1613_v44  ;;  %1472 = vmatpush3.bf16.msra.mxu0 %v1583_v57 }
  0xac   :  { %1473 = vmatprep.subr.bf16.mxu0 %v1613_v44 }
  0xae   :  { %1494 = vmatpush3.bf16.msra.mxu1 %v1576_v50 }
  0xaf   :  { %1495 = vmatprep.subr.bf16.mxu1 %v1613_v44  ;;  %1474 = vmatpush3.bf16.msra.mxu0 %v1584_v58 }
  0xb0   :  { %1475 = vmatprep.subr.bf16.mxu0 %v1613_v44 }
  0xb2   :  { %1496 = vmatpush3.bf16.msra.mxu1 %v1577_v51 }
  0xb3   :  { %1476 = vmatpush3.bf16.msra.mxu0 %v1585_v59 }
 0x107   :  { %v1283_v60 = vpop.f32.mrb[0].mxu0 }
 0x108   :  { %v1305_v61 = vpop.f32.mrb[0].mxu1  ;;  %v1284_v63 = vpop.f32.mrb[1].mxu0 }
 0x109   :  { %v1285_v32 = vadd.f32 %v1284_v63, %v1283_v60  ;;  %v1306_v33 = vpop.f32.mrb[1].mxu1  ;;  %v1286_v34 = vpop.f32.mrb[2].mxu0 }
 0x10a   :  { %v1307_v36 = vadd.f32 %v1306_v33, %v1305_v61  ;;  %v1308_v37 = vpop.f32.mrb[2].mxu1  ;;  %v1287_v42 = vpop.f32.mrb[3].mxu0 }
 0x10b   :  { %v619_v43 = vadd.f32 %v1285_v32, %v1176_v62  ;;  %v1288_v39 = vadd.f32 %v1287_v42, %v1286_v34  ;;  %v1309_v38 = vpop.f32.mrb[3].mxu1 }
 0x10c   :  { %v1310_v40 = vadd.f32 %v1309_v38, %v1308_v37 }
 0x10d   :  { %v660_v41 = vadd.f32 %v1307_v36, %v619_v43  ;;  %v622_v0 = vadd.f32 %v1288_v39, %v1176_v62 }
 0x10f   :  { %v663_v1 = vadd.f32 %v1310_v40, %v622_v0 }
 0x127   :  { %v1327_v35 = vpop.f32.mrb[4].mxu0 }
 0x128   :  { %v1349_v2 = vpop.f32.mrb[4].mxu1  ;;  %v1328_v3 = vpop.f32.mrb[5].mxu0 }
 0x129   :  { %v1329_v4 = vadd.f32 %v1328_v3, %v1327_v35  ;;  %v1350_v5 = vpop.f32.mrb[5].mxu1  ;;  %v1330_v6 = vpop.f32.mrb[6].mxu0 }
 0x12a   :  { %v1351_v7 = vadd.f32 %v1350_v5, %v1349_v2  ;;  %v1352_v8 = vpop.f32.mrb[6].mxu1  ;;  %v1331_v9 = vpop.f32.mrb[7].mxu0 }
 0x12b   :  { %v701_v10 = vadd.f32 %v1329_v4, %v660_v41  ;;  %v1332_v11 = vadd.f32 %v1331_v9, %v1330_v6  ;;  %v1353_v12 = vpop.f32.mrb[7].mxu1  ;;  %v1257_v41 = vld [vmem:[%s2250_s6] ss:$0 sm:$0xff] }
 0x12c   :  { %v1354_v13 = vadd.f32 %v1353_v12, %v1352_v8 }
 0x12d   :  { %v742_v14 = vadd.f32 %v1351_v7, %v701_v10  ;;  %v704_v15 = vadd.f32 %v1332_v11, %v663_v1 }
 0x12f   :  { %v745_v16 = vadd.f32 %v1354_v13, %v704_v15  ;;  %v748_v17 = vmax.f32 %v742_v14, 0.0 }
 0x131   :  { %v749_v18 = vmax.f32 %v745_v16, 0.0 }
 0x133   :  { %v750_v19 = vpack.c.bf16 %v749_v18, %v748_v17 }
 0x135   :  { %1498 = vmatmul.mubr.bf16.vlgmr.msra.gmra.mrb[16].mxu1 %v750_v19 }
 0x147   :  { %v1371_v20 = vpop.f32.mrb[8].mxu0 }
 0x148   :  { %v1393_v21 = vpop.f32.mrb[8].mxu1  ;;  %v1372_v22 = vpop.f32.mrb[9].mxu0 }
 0x149   :  { %v1373_v23 = vadd.f32 %v1372_v22, %v1371_v20  ;;  %v1394_v24 = vpop.f32.mrb[9].mxu1  ;;  %v1374_v25 = vpop.f32.mrb[10].mxu0 }
 0x14a   :  { %v1395_v26 = vadd.f32 %v1394_v24, %v1393_v21  ;;  %v1396_v27 = vpop.f32.mrb[10].mxu1  ;;  %v1375_v28 = vpop.f32.mrb[11].mxu0 }
 0x14b   :  { %v810_v29 = vadd.f32 %v1373_v23, %v1176_v62  ;;  %v1376_v30 = vadd.f32 %v1375_v28, %v1374_v25  ;;  %v1397_v31 = vpop.f32.mrb[11].mxu1 }
 0x14c   :  { %v1398_v44 = vadd.f32 %v1397_v31, %v1396_v27 }
 0x14d   :  { %v851_v45 = vadd.f32 %v1395_v26, %v810_v29  ;;  %v813_v46 = vadd.f32 %v1376_v30, %v1176_v62 }
 0x14f   :  { %v854_v47 = vadd.f32 %v1398_v44, %v813_v46 }
 0x167   :  { %v1415_v48 = vpop.f32.mrb[12].mxu0 }
 0x168   :  { %v1437_v49 = vpop.f32.mrb[12].mxu1  ;;  %v1416_v50 = vpop.f32.mrb[13].mxu0 }
 0x169   :  { %v1417_v51 = vadd.f32 %v1416_v50, %v1415_v48  ;;  %v1438_v52 = vpop.f32.mrb[13].mxu1  ;;  %v1418_v53 = vpop.f32.mrb[14].mxu0 }
 0x16a   :  { %v1439_v54 = vadd.f32 %v1438_v52, %v1437_v49  ;;  %v1440_v55 = vpop.f32.mrb[14].mxu1  ;;  %v1419_v56 = vpop.f32.mrb[15].mxu0 }
 0x16b   :  { %v892_v57 = vadd.f32 %v1417_v51, %v851_v45  ;;  %v1420_v58 = vadd.f32 %v1419_v56, %v1418_v53  ;;  %v1441_v59 = vpop.f32.mrb[15].mxu1 }
 0x16c   :  { %v1442_v60 = vadd.f32 %v1441_v59, %v1440_v55 }
 0x16d   :  { %v933_v61 = vadd.f32 %v1439_v54, %v892_v57  ;;  %v895_v63 = vadd.f32 %v1420_v58, %v854_v47 }
 0x16f   :  { %v936_v32 = vadd.f32 %v1442_v60, %v895_v63  ;;  %v939_v33 = vmax.f32 %v933_v61, 0.0 }
 0x171   :  { %v940_v34 = vmax.f32 %v936_v32, 0.0 }
 0x173   :  { %v941_v62 = vpack.c.bf16 %v940_v34, %v939_v33 }
 0x175   :  { %1478 = vmatmul.mubr.bf16.vlgmr.msra.gmra.mrb[16].mxu0 %v941_v62 }
 0x208   :  { %v1145_v36 = vpop.f32.mrb[16].mxu1 }
 0x209   :  { %v1499_v37 = vpop.f32.mrb[17].mxu1 }
 0x20a   :  { %v1148_v42 = vpop.f32.mrb[18].mxu1 }
 0x20b   :  { %v1500_v43 = vpop.f32.mrb[19].mxu1 }
 0x248   :  { %v1056_v39 = vpop.f32.mrb[16].mxu0 }
 0x249   :  { %v1146_v38 = vadd.f32 %v1145_v36, %v1056_v39  ;;  %v1479_v40 = vpop.f32.mrb[17].mxu0 }
 0x24a   :  { %v1059_v0 = vpop.f32.mrb[18].mxu0 }
 0x24b   :  { %v1149_v1 = vadd.f32 %v1148_v42, %v1059_v0  ;;  %v1480_v35 = vpop.f32.mrb[19].mxu0  ;;  %v1159_v2 = vadd.f32 %v1257_v41, %v1146_v38 }
 0x24d   :  { %v1160_v3 = vadd.f32 %v1257_v41, %v1149_v1 }
 0x24f   :  { %v1265_v4 = vpack.c.bf16 %v1160_v3, %v1159_v2 }
 0x251   :  { %1266 = vst [vmem:[%s2251_s7] sm:$0xff] %v1265_v4  }
 0x252   :  { %1175 = vsyncpa [#allocation3], 1 }

</bundles_post_ra>
